<compile_context>
chip_gen: v5e
topology: v5e:2x2
jax: 0.10.0
libtpu: 0.0.40
codegen_flags: <defaults>
</compile_context>

<pallas_src>
import functools
import math

import jax
import jax.numpy as jnp
import numpy as np
from jax import lax
from jax.experimental import pallas as pl
from jax.experimental.pallas import tpu as pltpu

_HIGHEST = jax.lax.Precision.HIGHEST

# "TN" contraction: contract dim 0 of the (TE, N) one-hot with dim 0 of the
# per-edge values -> (N, W) scatter-sum by tail node.
_TN = (((0,), (0,)), ((), ()))


def _round_up(x, m):
    return ((x + m - 1) // m) * m


def _vmem_limit_bytes():
    try:
        cap = pltpu.get_tpu_info().vmem_capacity_bytes
        return int(min(cap * 3 // 4, 96 * 1024 * 1024))
    except Exception:
        return 32 * 1024 * 1024


def _invariant_spec(shape, grid_rank):
    """Block-invariant input: constant index_map, single-buffered if possible."""
    zeros = (0,) * len(shape)
    if grid_rank == 1:
        idx = lambda i: zeros
    else:
        idx = lambda c, t: zeros
    try:
        return pl.BlockSpec(shape, idx, pipeline_mode=pl.Buffered(1))
    except TypeError:  # older BlockSpec without pipeline_mode
        return pl.BlockSpec(shape, idx)


# ---------------------------------------------------------------------------
# Pass 1: stream edge index tiles, accumulate per-tail softmax state.
# ---------------------------------------------------------------------------
def _ingram_edge_kernel(
    tail_ref, head_ref, rel_ref,          # (TE, 1) int32 (pad edges -> N_pad / R)
    emb_ent_ref,                          # (N_pad, Din) bf16
    emb_rel_ref,                          # (R, Dr)      bf16
    w_att_tail_ref, w_att_head_ref, w_att_rel_ref,   # (Din|Dr, Dp) bf16
    b_att_ref, attn_vec_ref,              # (1, Dp) f32
    w_agg_ent_ref, w_agg_rel_ref,         # (Din|Dr, Dp) bf16
    b_aggr_ref,                           # (1, Dp) f32
    pool_ref,                             # (Dp, H) bf16
    poolT_ref,                            # (H, Dp) f32
    acc_ref,                              # (N_pad, Dp) f32  out: un-normalized aggregation
    l_ref,                                # (N_pad, H)  f32  out: softmax denominators
    m_ref,                                # (1, H)      f32  out: per-head running max
    relsum_ref,                           # (N_pad, Dr) f32  out: rel-emb scatter sum
):
    f32, bf16 = jnp.float32, jnp.bfloat16
    dot = functools.partial(jnp.dot, preferred_element_type=f32)
    scat = functools.partial(lax.dot_general, dimension_numbers=_TN,
                             preferred_element_type=f32)

    t = pl.program_id(1)
    TE = tail_ref.shape[0]
    n_nodes = emb_ent_ref.shape[0]
    n_rel = emb_rel_ref.shape[0]
    Dp = acc_ref.shape[1]
    H = l_ref.shape[1]
    Dr = relsum_ref.shape[1]

    @pl.when(t == 0)
    def _init():
        acc_ref[...] = jnp.zeros_like(acc_ref)
        l_ref[...] = jnp.zeros_like(l_ref)
        m_ref[...] = jnp.zeros_like(m_ref)       # max includes 0 -> exp() <= 1
        relsum_ref[...] = jnp.zeros_like(relsum_ref)

    # ---- one-hots rebuilt in-kernel from int32 indices (no (TE, N) HBM) ----
    idx_th = jnp.concatenate([tail_ref[...], head_ref[...]], axis=0)   # (2TE, 1)
    iota_n = lax.broadcasted_iota(jnp.int32, (2 * TE, n_nodes), 1)
    oh_th = jnp.where(iota_n == idx_th, 1.0, 0.0).astype(bf16)         # (2TE, N)
    tg = oh_th[:TE, :]                                                 # tail one-hot

    iota_r = lax.broadcasted_iota(jnp.int32, (TE, n_rel), 1)
    rg = jnp.where(iota_r == rel_ref[...], 1.0, 0.0).astype(bf16)      # (TE, R)

    # ---- gathers: one row-stacked MXU pass over emb_ent, one over emb_rel --
    ent_th = dot(oh_th, emb_ent_ref[...])                              # (2TE, Din)
    ent_tail = ent_th[:TE].astype(bf16)        # exact: rows of bf16 emb_ent
    ent_head = ent_th[TE:].astype(bf16)
    rel_e = dot(rg, emb_rel_ref[...])                                  # (TE, Dr)
    rel_bf = rel_e.astype(bf16)

    # ---- attention logits: split-K bf16 projections (no concat copies) -----
    x_att = (dot(ent_tail, w_att_tail_ref[...])
             + dot(ent_head, w_att_head_ref[...])
             + dot(rel_bf, w_att_rel_ref[...]) + b_att_ref[...])
    x_att = jnp.where(x_att > 0, x_att, 0.2 * x_att)                   # LeakyReLU(0.2)
    logit = dot((x_att * attn_vec_ref[...]).astype(bf16), pool_ref[...])   # (TE, H)

    # ---- online softmax with a global per-head running max -----------------
    m_old = m_ref[...]
    m_new = jnp.maximum(m_old, jnp.max(logit, axis=0, keepdims=True))  # (1, H)
    scale = jnp.exp(m_old - m_new)
    m_ref[...] = m_new
    p = jnp.exp(logit - m_new)                                         # (TE, H)

    # ---- aggregation values -------------------------------------------------
    x_aggr = (dot(ent_head, w_agg_ent_ref[...])
              + dot(rel_bf, w_agg_rel_ref[...]) + b_aggr_ref[...])     # (TE, Dp)
    weighted = dot(p, poolT_ref[...]) * x_aggr                         # (TE, Dp)

    # ---- single fused tail-scatter: [weighted | p | rel_e] ------------------
    vals = jnp.concatenate([weighted, p, rel_e], axis=1).astype(bf16)  # (TE, Dp+H+Dr)
    scattered = scat(tg, vals)                                         # (N, Dp+H+Dr)

    # TODO(synk): guard the rescale with pl.when once the running max stops
    #             moving (needs a vector->scalar predicate); exact as-is.
    acc_ref[...] = acc_ref[...] * dot(scale, poolT_ref[...]) + scattered[:, :Dp]
    l_ref[...] = l_ref[...] * scale + scattered[:, Dp:Dp + H]
    relsum_ref[...] = relsum_ref[...] + scattered[:, Dp + H:Dp + H + Dr]


# ---------------------------------------------------------------------------
# Pass 2: combine edge partitions, add self-loop edge, normalize (tiled over N).
# ---------------------------------------------------------------------------
def _ingram_finalize_kernel(
    emb_ent_ref,      # (TN, Din) bf16
    inv_freq_ref,     # (TN, 1)   f32
    acc_ref,          # (P, TN, Dp) f32
    l_ref,            # (P, TN, H)  f32
    m_ref,            # (P, 1, H)   f32
    relsum_ref,       # (P, TN, Dr) f32
    w_att_self_ref,   # (Din, Dp) bf16  (= w_att[:Din] + w_att[Din:2Din])
    w_att_rel_ref,    # (Dr, Dp)  bf16
    b_att_ref, attn_vec_ref,             # (1, Dp) f32
    w_agg_ent_ref, w_agg_rel_ref,        # (Din|Dr, Dp) bf16
    b_aggr_ref,                          # (1, Dp) f32
    pool_ref,                            # (Dp, H) bf16
    poolT_ref,                           # (H, Dp) f32
    out_ref,                             # (TN, Dp) f32
):
    f32, bf16 = jnp.float32, jnp.bfloat16
    dot = functools.partial(jnp.dot, preferred_element_type=f32)
    n_parts = acc_ref.shape[0]
    poolT = poolT_ref[...]

    # ---- combine per-partition partial sums (exact algebra) -----------------
    m_tot = m_ref[0]
    for c in range(1, n_parts):
        m_tot = jnp.maximum(m_tot, m_ref[c])
    l_e = jnp.zeros(l_ref.shape[1:], f32)
    acc_e = jnp.zeros(acc_ref.shape[1:], f32)
    rel_sum = jnp.zeros(relsum_ref.shape[1:], f32)
    for c in range(n_parts):
        s = jnp.exp(m_ref[c] - m_tot)                    # (1, H)
        l_e = l_e + l_ref[c] * s
        acc_e = acc_e + acc_ref[c] * dot(s, poolT)
        rel_sum = rel_sum + relsum_ref[c]

    # ---- self-loop edge (tail == head == node) ------------------------------
    ent = emb_ent_ref[...]
    self_rel = rel_sum * inv_freq_ref[...]               # (TN, Dr)
    self_rel_bf = self_rel.astype(bf16)

    xs = (dot(ent, w_att_self_ref[...]) + dot(self_rel_bf, w_att_rel_ref[...])
          + b_att_ref[...])
    xs = jnp.where(xs > 0, xs, 0.2 * xs)
    logit_s = dot((xs * attn_vec_ref[...]).astype(bf16), pool_ref[...])    # (TN, H)

    m_fin = jnp.maximum(m_tot, logit_s)                  # per-node refinement
    resc = jnp.exp(m_tot - m_fin)
    p_s = jnp.exp(logit_s - m_fin)
    l_fin = l_e * resc + p_s

    xa = (dot(ent, w_agg_ent_ref[...]) + dot(self_rel_bf, w_agg_rel_ref[...])
          + b_aggr_ref[...])
    acc_fin = acc_e * dot(resc, poolT) + dot(p_s, poolT) * xa
    out_ref[...] = acc_fin / (dot(l_fin, poolT) + 1e-16)


def ingram_entity_forward(emb_ent, emb_rel, head_idxs, tail_idxs, rel_idxs,
                          params, num_head, *, tile_e=512, tile_n=256,
                          num_edge_partitions=2):
    """Pallas implementation of InGramEntityLayer.forward (single graph)."""
    N, Din = emb_ent.shape
    R, Dr = emb_rel.shape
    E = int(head_idxs.shape[0])
    Dout = params["w_att"].shape[1]
    Dh = Dout // num_head
    Dp = _round_up(Dout, 128)                 # lane-dense padded output width
    P = max(1, int(num_edge_partitions))
    f32, bf16 = jnp.float32, jnp.bfloat16

    # ---- node tiling (finalize grid) and node padding ------------------------
    TN = min(_round_up(tile_n, 8), _round_up(N, 8))
    N_pad = _round_up(N, TN)

    # ---- edge tiling over a (partition, tile) grid ----------------------------
    TE = _round_up(max(8, min(tile_e, _round_up(E, 8))), 8)
    n_per_part = max(1, -(-E // (P * TE)))    # ceil
    E_pad = P * n_per_part * TE
    pad_e = E_pad - E

    def pad_idx(idx, fill):
        idx = idx.astype(jnp.int32)
        if pad_e:
            idx = jnp.concatenate([idx, jnp.full((pad_e,), fill, jnp.int32)])
        return idx.reshape(E_pad, 1)

    # padded edges point past the one-hot range -> zero rows (no gather/scatter)
    tail_p = pad_idx(tail_idxs, N_pad)
    head_p = pad_idx(head_idxs, N_pad)
    rel_p = pad_idx(rel_idxs, R)

    emb_ent_p = jnp.pad(emb_ent, ((0, N_pad - N), (0, 0))).astype(bf16)
    emb_rel_bf = emb_rel.astype(bf16)

    freq = jax.ops.segment_sum(jnp.ones((E,), f32), tail_idxs, N)
    # clamp: in-degree >= 1 is a module precondition (self_rel is a mean over
    # incoming edges); zero-in-degree nodes get self_rel = 0 instead of NaN.
    inv_freq = (1.0 / jnp.maximum(freq, 1.0)).reshape(N, 1)
    inv_freq_p = jnp.pad(inv_freq, ((0, N_pad - N), (0, 0)), constant_values=1.0)

    # ---- weights: lane-pad to Dp, split K, bf16 MXU operands -----------------
    def padw(w):
        return jnp.pad(w, ((0, 0), (0, Dp - Dout)))

    w_att = padw(params["w_att"])
    w_att_tail = w_att[:Din].astype(bf16)
    w_att_head = w_att[Din:2 * Din].astype(bf16)
    w_att_rel = w_att[2 * Din:].astype(bf16)
    w_att_self = (w_att[:Din] + w_att[Din:2 * Din]).astype(bf16)   # folded self-loop
    w_aggr = padw(params["w_aggr"])
    w_agg_ent = w_aggr[:Din].astype(bf16)
    w_agg_rel = w_aggr[Din:].astype(bf16)
    b_att = padw(params["b_att"])
    b_aggr = padw(params["b_aggr"])
    attn_vec = padw(params["attn_vec"].reshape(1, Dout))

    pool = jnp.pad(jnp.repeat(jnp.eye(num_head, dtype=f32), Dh, axis=0),
                   ((0, Dp - Dout), (0, 0)))                       # (Dp, H)
    poolT = pool.T                                                 # (H, Dp)
    pool_bf = pool.astype(bf16)

    H = num_head
    vmem_limit = _vmem_limit_bytes()

    # ---- pass 1: edge accumulation (parallel partitions x arbitrary tiles) ---
    def edge_spec():
        return pl.BlockSpec((TE, 1), lambda c, t: (c * n_per_part + t, 0))

    out_shape1 = (
        jax.ShapeDtypeStruct((P, N_pad, Dp), f32),
        jax.ShapeDtypeStruct((P, N_pad, H), f32),
        jax.ShapeDtypeStruct((P, 1, H), f32),
        jax.ShapeDtypeStruct((P, N_pad, Dr), f32),
    )
    out_specs1 = [
        pl.BlockSpec((None, N_pad, Dp), lambda c, t: (c, 0, 0)),
        pl.BlockSpec((None, N_pad, H), lambda c, t: (c, 0, 0)),
        pl.BlockSpec((None, 1, H), lambda c, t: (c, 0, 0)),
        pl.BlockSpec((None, N_pad, Dr), lambda c, t: (c, 0, 0)),
    ]
    in_specs1 = [
        edge_spec(), edge_spec(), edge_spec(),
        _invariant_spec((N_pad, Din), 2),
        _invariant_spec((R, Dr), 2),
        _invariant_spec((Din, Dp), 2),
        _invariant_spec((Din, Dp), 2),
        _invariant_spec((Dr, Dp), 2),
        _invariant_spec((1, Dp), 2),
        _invariant_spec((1, Dp), 2),
        _invariant_spec((Din, Dp), 2),
        _invariant_spec((Dr, Dp), 2),
        _invariant_spec((1, Dp), 2),
        _invariant_spec((Dp, H), 2),
        _invariant_spec((H, Dp), 2),
    ]
    acc, l_part, m_part, rel_part = pl.pallas_call(
        _ingram_edge_kernel,
        out_shape=out_shape1,
        grid_spec=pltpu.PrefetchScalarGridSpec(
            num_scalar_prefetch=0,
            grid=(P, n_per_part),
            in_specs=in_specs1,
            out_specs=out_specs1),
        compiler_params=pltpu.CompilerParams(
            dimension_semantics=("parallel", "arbitrary"),
            vmem_limit_bytes=vmem_limit),
    )(tail_p, head_p, rel_p, emb_ent_p, emb_rel_bf,
      w_att_tail, w_att_head, w_att_rel, b_att, attn_vec,
      w_agg_ent, w_agg_rel, b_aggr, pool_bf, poolT)

    # ---- pass 2: combine partitions + self-loop + normalize (parallel over N)
    in_specs2 = [
        pl.BlockSpec((TN, Din), lambda i: (i, 0)),
        pl.BlockSpec((TN, 1), lambda i: (i, 0)),
        pl.BlockSpec((P, TN, Dp), lambda i: (0, i, 0)),
        pl.BlockSpec((P, TN, H), lambda i: (0, i, 0)),
        _invariant_spec((P, 1, H), 1),
        pl.BlockSpec((P, TN, Dr), lambda i: (0, i, 0)),
        _invariant_spec((Din, Dp), 1),
        _invariant_spec((Dr, Dp), 1),
        _invariant_spec((1, Dp), 1),
        _invariant_spec((1, Dp), 1),
        _invariant_spec((Din, Dp), 1),
        _invariant_spec((Dr, Dp), 1),
        _invariant_spec((1, Dp), 1),
        _invariant_spec((Dp, H), 1),
        _invariant_spec((H, Dp), 1),
    ]
    out_pad = pl.pallas_call(
        _ingram_finalize_kernel,
        out_shape=jax.ShapeDtypeStruct((N_pad, Dp), f32),
        grid_spec=pltpu.PrefetchScalarGridSpec(
            num_scalar_prefetch=0,
            grid=(N_pad // TN,),
            in_specs=in_specs2,
            out_specs=pl.BlockSpec((TN, Dp), lambda i: (i, 0))),
        compiler_params=pltpu.CompilerParams(
            dimension_semantics=("parallel",),
            vmem_limit_bytes=vmem_limit),
    )(emb_ent_p, inv_freq_p, acc, l_part, m_part, rel_part,
      w_att_self, w_att_rel, b_att, attn_vec,
      w_agg_ent, w_agg_rel, b_aggr, pool_bf, poolT)

    return out_pad[:N, :Dout]


# ---- pure-JAX reference (mirrors the PyTorch code, f32 / HIGHEST) ----------
def ingram_entity_reference(emb_ent, emb_rel, head_idxs, tail_idxs, rel_idxs,
                            params, num_head):
    N, Din = emb_ent.shape
    Dr = emb_rel.shape[1]
    Dout = params["w_att"].shape[1]
    Dh = Dout // num_head

    rel_e = emb_rel[rel_idxs]
    ones = jnp.ones((tail_idxs.shape[0],), jnp.float32)
    ent_freq = jax.ops.segment_sum(ones, tail_idxs, N)[:, None]
    self_rel = jax.ops.segment_sum(rel_e, tail_idxs, N) / ent_freq
    emb_rels = jnp.concatenate([rel_e, self_rel], axis=0)
    tail_all = jnp.concatenate([tail_idxs, jnp.arange(N, dtype=tail_idxs.dtype)])
    head_all = jnp.concatenate([head_idxs, jnp.arange(N, dtype=head_idxs.dtype)])

    concat_att = jnp.concatenate(
        [emb_ent[tail_all], emb_ent[head_all], emb_rels], axis=1)
    x = jnp.dot(concat_att, params["w_att"], precision=_HIGHEST) + params["b_att"]
    x = jnp.where(x > 0, x, 0.2 * x).reshape(-1, num_head, Dh)
    attn_raw = (x * params["attn_vec"].reshape(1, num_head, Dh)).sum(-1)
    attn_max = jax.ops.segment_max(attn_raw, tail_all, N)
    attn_val = jnp.exp(attn_raw - attn_max[tail_all])
    attn_sums = jax.ops.segment_sum(attn_val, tail_all, N)
    beta = attn_val / (attn_sums[tail_all] + 1e-16)

    concat_aggr = jnp.concatenate([emb_ent[head_all], emb_rels], axis=1)
    xa = (jnp.dot(concat_aggr, params["w_aggr"], precision=_HIGHEST)
          + params["b_aggr"]).reshape(-1, num_head, Dh)
    out = jax.ops.segment_sum(beta[:, :, None] * xa, tail_all, N)
    return out.reshape(N, Dout)


def xavier_normal(key, shape, fan_in, fan_out, gain):
    std = gain * math.sqrt(2.0 / (fan_in + fan_out))
    return std * jax.random.normal(key, shape, dtype=jnp.float32)


if __name__ == "__main__":
    # Small synthetic graph (single batch => cum_idx offsets are all zero).
    N, Din, Dr, Dout, H = 16, 32, 16, 32, 8    # num_ent, dim_in, dim_rel, dim_out, heads
    R = 6                                       # args.aug_num_rels (one graph)
    E_extra = 8
    gain = math.sqrt(2.0)                       # nn.init.calculate_gain('relu')

    keys = iter(jax.random.split(jax.random.PRNGKey(0), 10))
    emb_ent = jax.random.normal(next(keys), (N, Din), dtype=jnp.float32)
    emb_rel = jax.random.normal(next(keys), (R, Dr), dtype=jnp.float32)

    # Ring edges guarantee every node has in-degree >= 1 (so ent_freq > 0),
    # plus some random extra edges.
    tail_fixed = jnp.arange(N, dtype=jnp.int32)
    head_fixed = jnp.mod(tail_fixed + 1, N).astype(jnp.int32)
    head_rand = jax.random.randint(next(keys), (E_extra,), 0, N, dtype=jnp.int32)
    tail_rand = jax.random.randint(next(keys), (E_extra,), 0, N, dtype=jnp.int32)
    head_idxs = jnp.concatenate([head_fixed, head_rand])
    tail_idxs = jnp.concatenate([tail_fixed, tail_rand])
    E = int(head_idxs.shape[0])
    rel_idxs = jax.random.randint(next(keys), (E,), 0, R, dtype=jnp.int32)

    params = {
        "w_att": xavier_normal(next(keys), (2 * Din + Dr, Dout),
                               2 * Din + Dr, Dout, gain),
        "b_att": jnp.zeros((1, Dout), jnp.float32),
        "attn_vec": xavier_normal(next(keys), (1, Dout), Dout, Dout // H, gain),
        "w_aggr": xavier_normal(next(keys), (Din + Dr, Dout), Din + Dr, Dout, gain),
        "b_aggr": jnp.zeros((1, Dout), jnp.float32),
    }

    # tile_e=8, 2 edge partitions -> grid (2, 2): exercises init / accumulate /
    # partition-combine; tile_n=8 -> 2 finalize tiles (tiled, parallel).
    out = ingram_entity_forward(emb_ent, emb_rel, head_idxs, tail_idxs,
                                rel_idxs, params, H, tile_e=8, tile_n=8,
                                num_edge_partitions=2)
    out = jax.block_until_ready(out)

    ref = ingram_entity_reference(emb_ent, emb_rel, head_idxs, tail_idxs,
                                  rel_idxs, params, H)
    # bf16 gathers/scatters/projections vs. f32 HIGHEST reference.
    np.testing.assert_allclose(np.asarray(out), np.asarray(ref),
                               rtol=5e-2, atol=5e-2)
    print("KERNEL_OK")
</pallas_src>

<mosaic_0001>
module attributes {stable_mosaic.version = 11 : i64} {
  func.func @_ingram_edge_kernel(%arg0: i32, %arg1: i32, %arg2: memref<8x1xi32, #tpu.memory_space<vmem>>, %arg3: memref<8x1xi32, #tpu.memory_space<vmem>>, %arg4: memref<8x1xi32, #tpu.memory_space<vmem>>, %arg5: memref<16x32xbf16, #tpu.memory_space<vmem>>, %arg6: memref<6x16xbf16, #tpu.memory_space<vmem>>, %arg7: memref<32x128xbf16, #tpu.memory_space<vmem>>, %arg8: memref<32x128xbf16, #tpu.memory_space<vmem>>, %arg9: memref<16x128xbf16, #tpu.memory_space<vmem>>, %arg10: memref<1x128xf32, #tpu.memory_space<vmem>>, %arg11: memref<1x128xf32, #tpu.memory_space<vmem>>, %arg12: memref<32x128xbf16, #tpu.memory_space<vmem>>, %arg13: memref<16x128xbf16, #tpu.memory_space<vmem>>, %arg14: memref<1x128xf32, #tpu.memory_space<vmem>>, %arg15: memref<128x8xbf16, #tpu.memory_space<vmem>>, %arg16: memref<8x128xf32, #tpu.memory_space<vmem>>, %arg17: memref<1x16x128xf32, #tpu.memory_space<vmem>>, %arg18: memref<1x16x8xf32, #tpu.memory_space<vmem>>, %arg19: memref<1x1x8xf32, #tpu.memory_space<vmem>>, %arg20: memref<1x16x16xf32, #tpu.memory_space<vmem>>) attributes {dimension_semantics = [#tpu.dimension_semantics<parallel>, #tpu.dimension_semantics<arbitrary>], iteration_bounds = array<i64: 2, 2>, scalar_prefetch = 0 : i64, scratch_operands = 0 : i64, tpu.core_type = #tpu.core_type<tc>, window_params = [{transform_indices = @transform_0, window_bounds = array<i64: 8, 1>}, {transform_indices = @transform_1, window_bounds = array<i64: 8, 1>}, {transform_indices = @transform_2, window_bounds = array<i64: 8, 1>}, {pipeline_mode = #tpu.pipeline_mode<synchronous>, transform_indices = @transform_3, window_bounds = array<i64: 16, 32>}, {pipeline_mode = #tpu.pipeline_mode<synchronous>, transform_indices = @transform_4, window_bounds = array<i64: 6, 16>}, {pipeline_mode = #tpu.pipeline_mode<synchronous>, transform_indices = @transform_5, window_bounds = array<i64: 32, 128>}, {pipeline_mode = #tpu.pipeline_mode<synchronous>, transform_indices = @transform_6, window_bounds = array<i64: 32, 128>}, {pipeline_mode = #tpu.pipeline_mode<synchronous>, transform_indices = @transform_7, window_bounds = array<i64: 16, 128>}, {pipeline_mode = #tpu.pipeline_mode<synchronous>, transform_indices = @transform_8, window_bounds = array<i64: 1, 128>}, {pipeline_mode = #tpu.pipeline_mode<synchronous>, transform_indices = @transform_9, window_bounds = array<i64: 1, 128>}, {pipeline_mode = #tpu.pipeline_mode<synchronous>, transform_indices = @transform_10, window_bounds = array<i64: 32, 128>}, {pipeline_mode = #tpu.pipeline_mode<synchronous>, transform_indices = @transform_11, window_bounds = array<i64: 16, 128>}, {pipeline_mode = #tpu.pipeline_mode<synchronous>, transform_indices = @transform_12, window_bounds = array<i64: 1, 128>}, {pipeline_mode = #tpu.pipeline_mode<synchronous>, transform_indices = @transform_13, window_bounds = array<i64: 128, 8>}, {pipeline_mode = #tpu.pipeline_mode<synchronous>, transform_indices = @transform_14, window_bounds = array<i64: 8, 128>}, {transform_indices = @transform_15, window_bounds = array<i64: 1, 16, 128>}, {transform_indices = @transform_16, window_bounds = array<i64: 1, 16, 8>}, {transform_indices = @transform_17, window_bounds = array<i64: 1, 1, 8>}, {transform_indices = @transform_18, window_bounds = array<i64: 1, 16, 16>}]} {
    %c0_i32 = arith.constant 0 : i32
    %0 = arith.cmpi eq, %arg1, %c0_i32 : i32
    %1 = arith.extui %0 : i1 to i32
    %c0_i32_0 = arith.constant 0 : i32
    %2 = arith.cmpi ne, %1, %c0_i32_0 : i32
    scf.if %2 {
      %cst_73 = arith.constant 0.000000e+00 : f32
      %107 = vector.broadcast %cst_73 : f32 to vector<16x128xf32>
      %c0_74 = arith.constant 0 : index
      %c0_75 = arith.constant 0 : index
      %c0_76 = arith.constant 0 : index
      %108 = vector.load %arg17[%c0_74, %c0_75, %c0_76] : memref<1x16x128xf32, #tpu.memory_space<vmem>>, vector<1x16x128xf32>
      %109 = vector.shape_cast %108 : vector<1x16x128xf32> to vector<16x128xf32>
      %110 = vector.shape_cast %107 : vector<16x128xf32> to vector<1x16x128xf32>
      tpu.vector_store %arg17[%c0_74, %c0_75, %c0_76], %110 {strides = array<i32>} : memref<1x16x128xf32, #tpu.memory_space<vmem>>, vector<1x16x128xf32>,
      %cst_77 = arith.constant 0.000000e+00 : f32
      %111 = vector.broadcast %cst_77 : f32 to vector<16x8xf32>
      %c0_78 = arith.constant 0 : index
      %c0_79 = arith.constant 0 : index
      %c0_80 = arith.constant 0 : index
      %112 = vector.load %arg18[%c0_78, %c0_79, %c0_80] : memref<1x16x8xf32, #tpu.memory_space<vmem>>, vector<1x16x8xf32>
      %113 = vector.shape_cast %112 : vector<1x16x8xf32> to vector<16x8xf32>
      %114 = vector.shape_cast %111 : vector<16x8xf32> to vector<1x16x8xf32>
      tpu.vector_store %arg18[%c0_78, %c0_79, %c0_80], %114 {strides = array<i32>} : memref<1x16x8xf32, #tpu.memory_space<vmem>>, vector<1x16x8xf32>,
      %cst_81 = arith.constant 0.000000e+00 : f32
      %115 = vector.broadcast %cst_81 : f32 to vector<1x8xf32>
      %c0_82 = arith.constant 0 : index
      %c0_83 = arith.constant 0 : index
      %c0_84 = arith.constant 0 : index
      %116 = vector.load %arg19[%c0_82, %c0_83, %c0_84] : memref<1x1x8xf32, #tpu.memory_space<vmem>>, vector<1x1x8xf32>
      %117 = vector.shape_cast %116 : vector<1x1x8xf32> to vector<1x8xf32>
      %118 = vector.shape_cast %115 : vector<1x8xf32> to vector<1x1x8xf32>
      tpu.vector_store %arg19[%c0_82, %c0_83, %c0_84], %118 {strides = array<i32>} : memref<1x1x8xf32, #tpu.memory_space<vmem>>, vector<1x1x8xf32>,
      %cst_85 = arith.constant 0.000000e+00 : f32
      %119 = vector.broadcast %cst_85 : f32 to vector<16x16xf32>
      %c0_86 = arith.constant 0 : index
      %c0_87 = arith.constant 0 : index
      %c0_88 = arith.constant 0 : index
      %120 = vector.load %arg20[%c0_86, %c0_87, %c0_88] : memref<1x16x16xf32, #tpu.memory_space<vmem>>, vector<1x16x16xf32>
      %121 = vector.shape_cast %120 : vector<1x16x16xf32> to vector<16x16xf32>
      %122 = vector.shape_cast %119 : vector<16x16xf32> to vector<1x16x16xf32>
      tpu.vector_store %arg20[%c0_86, %c0_87, %c0_88], %122 {strides = array<i32>} : memref<1x16x16xf32, #tpu.memory_space<vmem>>, vector<1x16x16xf32>,
    } else {
    }
    %c0 = arith.constant 0 : index
    %c0_1 = arith.constant 0 : index
    %3 = vector.load %arg2[%c0, %c0_1] : memref<8x1xi32, #tpu.memory_space<vmem>>, vector<8x1xi32>
    %c0_2 = arith.constant 0 : index
    %c0_3 = arith.constant 0 : index
    %4 = vector.load %arg3[%c0_2, %c0_3] : memref<8x1xi32, #tpu.memory_space<vmem>>, vector<8x1xi32>
    %5 = tpu.concatenate %3, %4 in 0 : vector<8x1xi32>, vector<8x1xi32> -> vector<16x1xi32>
    %6 = tpu.iota {dimensions = array<i32: 1>} : vector<16x16xi32>
    %7 = vector.broadcast %5 : vector<16x1xi32> to vector<16x16xi32>
    %8 = arith.cmpi eq, %6, %7 : vector<16x16xi32>
    %cst = arith.constant 1.000000e+00 : f32
    %cst_4 = arith.constant 0.000000e+00 : f32
    %9 = vector.broadcast %cst : f32 to vector<16x16xf32>
    %10 = vector.broadcast %cst_4 : f32 to vector<16x16xf32>
    %11 = arith.select %8, %9, %10 : vector<16x16xi1>, vector<16x16xf32>
    %12 = arith.truncf %11 : vector<16x16xf32> to vector<16x16xbf16>
    %13 = vector.extract_strided_slice %12 {offsets = [0, 0], sizes = [8, 16], strides = [1, 1]} : vector<16x16xbf16> to vector<8x16xbf16>
    %14 = tpu.iota {dimensions = array<i32: 1>} : vector<8x6xi32>
    %c0_5 = arith.constant 0 : index
    %c0_6 = arith.constant 0 : index
    %15 = vector.load %arg4[%c0_5, %c0_6] : memref<8x1xi32, #tpu.memory_space<vmem>>, vector<8x1xi32>
    %16 = vector.broadcast %15 : vector<8x1xi32> to vector<8x6xi32>
    %17 = arith.cmpi eq, %14, %16 : vector<8x6xi32>
    %cst_7 = arith.constant 1.000000e+00 : f32
    %cst_8 = arith.constant 0.000000e+00 : f32
    %18 = vector.broadcast %cst_7 : f32 to vector<8x6xf32>
    %19 = vector.broadcast %cst_8 : f32 to vector<8x6xf32>
    %20 = arith.select %17, %18, %19 : vector<8x6xi1>, vector<8x6xf32>
    %21 = arith.truncf %20 : vector<8x6xf32> to vector<8x6xbf16>
    %c0_9 = arith.constant 0 : index
    %c0_10 = arith.constant 0 : index
    %22 = vector.load %arg5[%c0_9, %c0_10] : memref<16x32xbf16, #tpu.memory_space<vmem>>, vector<16x32xbf16>
    %cst_11 = arith.constant dense<0.000000e+00> : vector<16x32xf32>
    %23 = tpu.matmul %12, %22, %cst_11 {dimension_numbers = #tpu.dot_dimension_numbers<[1], [0], [0], [1], [0, 0, 1, 1], [], []>} : vector<16x16xbf16>, vector<16x32xbf16>, vector<16x32xf32> -> vector<16x32xf32>
    %24 = vector.extract_strided_slice %23 {offsets = [0, 0], sizes = [8, 32], strides = [1, 1]} : vector<16x32xf32> to vector<8x32xf32>
    %25 = arith.truncf %24 : vector<8x32xf32> to vector<8x32xbf16>
    %26 = vector.extract_strided_slice %23 {offsets = [8, 0], sizes = [8, 32], strides = [1, 1]} : vector<16x32xf32> to vector<8x32xf32>
    %27 = arith.truncf %26 : vector<8x32xf32> to vector<8x32xbf16>
    %c0_12 = arith.constant 0 : index
    %c0_13 = arith.constant 0 : index
    %28 = vector.load %arg6[%c0_12, %c0_13] : memref<6x16xbf16, #tpu.memory_space<vmem>>, vector<6x16xbf16>
    %cst_14 = arith.constant dense<0.000000e+00> : vector<8x16xf32>
    %29 = tpu.matmul %21, %28, %cst_14 {dimension_numbers = #tpu.dot_dimension_numbers<[1], [0], [0], [1], [0, 0, 1, 1], [], []>} : vector<8x6xbf16>, vector<6x16xbf16>, vector<8x16xf32> -> vector<8x16xf32>
    %30 = arith.truncf %29 : vector<8x16xf32> to vector<8x16xbf16>
    %c0_15 = arith.constant 0 : index
    %c0_16 = arith.constant 0 : index
    %31 = vector.load %arg7[%c0_15, %c0_16] : memref<32x128xbf16, #tpu.memory_space<vmem>>, vector<32x128xbf16>
    %cst_17 = arith.constant dense<0.000000e+00> : vector<8x128xf32>
    %32 = tpu.matmul %25, %31, %cst_17 {dimension_numbers = #tpu.dot_dimension_numbers<[1], [0], [0], [1], [0, 0, 1, 1], [], []>} : vector<8x32xbf16>, vector<32x128xbf16>, vector<8x128xf32> -> vector<8x128xf32>
    %c0_18 = arith.constant 0 : index
    %c0_19 = arith.constant 0 : index
    %33 = vector.load %arg8[%c0_18, %c0_19] : memref<32x128xbf16, #tpu.memory_space<vmem>>, vector<32x128xbf16>
    %cst_20 = arith.constant dense<0.000000e+00> : vector<8x128xf32>
    %34 = tpu.matmul %27, %33, %cst_20 {dimension_numbers = #tpu.dot_dimension_numbers<[1], [0], [0], [1], [0, 0, 1, 1], [], []>} : vector<8x32xbf16>, vector<32x128xbf16>, vector<8x128xf32> -> vector<8x128xf32>
    %35 = arith.addf %32, %34 : vector<8x128xf32>
    %c0_21 = arith.constant 0 : index
    %c0_22 = arith.constant 0 : index
    %36 = vector.load %arg9[%c0_21, %c0_22] : memref<16x128xbf16, #tpu.memory_space<vmem>>, vector<16x128xbf16>
    %cst_23 = arith.constant dense<0.000000e+00> : vector<8x128xf32>
    %37 = tpu.matmul %30, %36, %cst_23 {dimension_numbers = #tpu.dot_dimension_numbers<[1], [0], [0], [1], [0, 0, 1, 1], [], []>} : vector<8x16xbf16>, vector<16x128xbf16>, vector<8x128xf32> -> vector<8x128xf32>
    %38 = arith.addf %35, %37 : vector<8x128xf32>
    %c0_24 = arith.constant 0 : index
    %c0_25 = arith.constant 0 : index
    %39 = vector.load %arg10[%c0_24, %c0_25] : memref<1x128xf32, #tpu.memory_space<vmem>>, vector<1x128xf32>
    %40 = vector.broadcast %39 : vector<1x128xf32> to vector<8x128xf32>
    %41 = arith.addf %38, %40 : vector<8x128xf32>
    %cst_26 = arith.constant 0.000000e+00 : f32
    %42 = vector.broadcast %cst_26 : f32 to vector<8x128xf32>
    %43 = arith.cmpf ogt, %41, %42 : vector<8x128xf32>
    %cst_27 = arith.constant 2.000000e-01 : f32
    %44 = vector.broadcast %cst_27 : f32 to vector<8x128xf32>
    %45 = arith.mulf %44, %41 : vector<8x128xf32>
    %46 = arith.select %43, %41, %45 : vector<8x128xi1>, vector<8x128xf32>
    %c0_28 = arith.constant 0 : index
    %c0_29 = arith.constant 0 : index
    %47 = vector.load %arg11[%c0_28, %c0_29] : memref<1x128xf32, #tpu.memory_space<vmem>>, vector<1x128xf32>
    %48 = vector.broadcast %47 : vector<1x128xf32> to vector<8x128xf32>
    %49 = arith.mulf %46, %48 : vector<8x128xf32>
    %50 = arith.truncf %49 : vector<8x128xf32> to vector<8x128xbf16>
    %c0_30 = arith.constant 0 : index
    %c0_31 = arith.constant 0 : index
    %51 = vector.load %arg15[%c0_30, %c0_31] : memref<128x8xbf16, #tpu.memory_space<vmem>>, vector<128x8xbf16>
    %cst_32 = arith.constant dense<0.000000e+00> : vector<8x8xf32>
    %52 = tpu.matmul %50, %51, %cst_32 {dimension_numbers = #tpu.dot_dimension_numbers<[1], [0], [0], [1], [0, 0, 1, 1], [], []>} : vector<8x128xbf16>, vector<128x8xbf16>, vector<8x8xf32> -> vector<8x8xf32>
    %c0_33 = arith.constant 0 : index
    %c0_34 = arith.constant 0 : index
    %c0_35 = arith.constant 0 : index
    %53 = vector.load %arg19[%c0_33, %c0_34, %c0_35] : memref<1x1x8xf32, #tpu.memory_space<vmem>>, vector<1x1x8xf32>
    %54 = vector.shape_cast %53 : vector<1x1x8xf32> to vector<1x8xf32>
    %cst_36 = arith.constant dense<0xFF800000> : vector<8xf32>
    %55 = vector.multi_reduction <maximumf>, %52, %cst_36 [0] : vector<8x8xf32> to vector<8xf32>
    %56 = vector.shape_cast %55 : vector<8xf32> to vector<1x8xf32>
    %57 = arith.maximumf %54, %56 : vector<1x8xf32>
    %58 = arith.subf %54, %57 : vector<1x8xf32>
    %59 = math.exp %58 : vector<1x8xf32>
    %c0_37 = arith.constant 0 : index
    %c0_38 = arith.constant 0 : index
    %c0_39 = arith.constant 0 : index
    %60 = vector.load %arg19[%c0_37, %c0_38, %c0_39] : memref<1x1x8xf32, #tpu.memory_space<vmem>>, vector<1x1x8xf32>
    %61 = vector.shape_cast %60 : vector<1x1x8xf32> to vector<1x8xf32>
    %62 = vector.shape_cast %57 : vector<1x8xf32> to vector<1x1x8xf32>
    tpu.vector_store %arg19[%c0_37, %c0_38, %c0_39], %62 {strides = array<i32>} : memref<1x1x8xf32, #tpu.memory_space<vmem>>, vector<1x1x8xf32>,
    %63 = vector.broadcast %57 : vector<1x8xf32> to vector<8x8xf32>
    %64 = arith.subf %52, %63 : vector<8x8xf32>
    %65 = math.exp %64 : vector<8x8xf32>
    %c0_40 = arith.constant 0 : index
    %c0_41 = arith.constant 0 : index
    %66 = vector.load %arg12[%c0_40, %c0_41] : memref<32x128xbf16, #tpu.memory_space<vmem>>, vector<32x128xbf16>
    %cst_42 = arith.constant dense<0.000000e+00> : vector<8x128xf32>
    %67 = tpu.matmul %27, %66, %cst_42 {dimension_numbers = #tpu.dot_dimension_numbers<[1], [0], [0], [1], [0, 0, 1, 1], [], []>} : vector<8x32xbf16>, vector<32x128xbf16>, vector<8x128xf32> -> vector<8x128xf32>
    %c0_43 = arith.constant 0 : index
    %c0_44 = arith.constant 0 : index
    %68 = vector.load %arg13[%c0_43, %c0_44] : memref<16x128xbf16, #tpu.memory_space<vmem>>, vector<16x128xbf16>
    %cst_45 = arith.constant dense<0.000000e+00> : vector<8x128xf32>
    %69 = tpu.matmul %30, %68, %cst_45 {dimension_numbers = #tpu.dot_dimension_numbers<[1], [0], [0], [1], [0, 0, 1, 1], [], []>} : vector<8x16xbf16>, vector<16x128xbf16>, vector<8x128xf32> -> vector<8x128xf32>
    %70 = arith.addf %67, %69 : vector<8x128xf32>
    %c0_46 = arith.constant 0 : index
    %c0_47 = arith.constant 0 : index
    %71 = vector.load %arg14[%c0_46, %c0_47] : memref<1x128xf32, #tpu.memory_space<vmem>>, vector<1x128xf32>
    %72 = vector.broadcast %71 : vector<1x128xf32> to vector<8x128xf32>
    %73 = arith.addf %70, %72 : vector<8x128xf32>
    %c0_48 = arith.constant 0 : index
    %c0_49 = arith.constant 0 : index
    %74 = vector.load %arg16[%c0_48, %c0_49] : memref<8x128xf32, #tpu.memory_space<vmem>>, vector<8x128xf32>
    %cst_50 = arith.constant dense<0.000000e+00> : vector<8x128xf32>
    %75 = tpu.matmul %65, %74, %cst_50 {dimension_numbers = #tpu.dot_dimension_numbers<[1], [0], [0], [1], [0, 0, 1, 1], [], []>} : vector<8x8xf32>, vector<8x128xf32>, vector<8x128xf32> -> vector<8x128xf32>
    %76 = arith.mulf %75, %73 : vector<8x128xf32>
    %77 = tpu.concatenate %76, %65, %29 in 1 : vector<8x128xf32>, vector<8x8xf32>, vector<8x16xf32> -> vector<8x152xf32>
    %78 = arith.truncf %77 : vector<8x152xf32> to vector<8x152xbf16>
    %cst_51 = arith.constant dense<0.000000e+00> : vector<16x152xf32>
    %79 = tpu.matmul %13, %78, %cst_51 {dimension_numbers = #tpu.dot_dimension_numbers<[0], [0], [1], [1], [0, 1, 1, 1], [], []>} : vector<8x16xbf16>, vector<8x152xbf16>, vector<16x152xf32> -> vector<16x152xf32>
    %c0_52 = arith.constant 0 : index
    %c0_53 = arith.constant 0 : index
    %c0_54 = arith.constant 0 : index
    %80 = vector.load %arg17[%c0_52, %c0_53, %c0_54] : memref<1x16x128xf32, #tpu.memory_space<vmem>>, vector<1x16x128xf32>
    %81 = vector.shape_cast %80 : vector<1x16x128xf32> to vector<16x128xf32>
    %c0_55 = arith.constant 0 : index
    %c0_56 = arith.constant 0 : index
    %82 = vector.load %arg16[%c0_55, %c0_56] : memref<8x128xf32, #tpu.memory_space<vmem>>, vector<8x128xf32>
    %cst_57 = arith.constant dense<0.000000e+00> : vector<1x128xf32>
    %83 = tpu.matmul %59, %82, %cst_57 {dimension_numbers = #tpu.dot_dimension_numbers<[1], [0], [0], [1], [0, 0, 1, 1], [], []>} : vector<1x8xf32>, vector<8x128xf32>, vector<1x128xf32> -> vector<1x128xf32>
    %84 = vector.broadcast %83 : vector<1x128xf32> to vector<16x128xf32>
    %85 = arith.mulf %81, %84 : vector<16x128xf32>
    %86 = vector.extract_strided_slice %79 {offsets = [0, 0], sizes = [16, 128], strides = [1, 1]} : vector<16x152xf32> to vector<16x128xf32>
    %87 = arith.addf %85, %86 : vector<16x128xf32>
    %c0_58 = arith.constant 0 : index
    %c0_59 = arith.constant 0 : index
    %c0_60 = arith.constant 0 : index
    %88 = vector.load %arg17[%c0_58, %c0_59, %c0_60] : memref<1x16x128xf32, #tpu.memory_space<vmem>>, vector<1x16x128xf32>
    %89 = vector.shape_cast %88 : vector<1x16x128xf32> to vector<16x128xf32>
    %90 = vector.shape_cast %87 : vector<16x128xf32> to vector<1x16x128xf32>
    tpu.vector_store %arg17[%c0_58, %c0_59, %c0_60], %90 {strides = array<i32>} : memref<1x16x128xf32, #tpu.memory_space<vmem>>, vector<1x16x128xf32>,
    %c0_61 = arith.constant 0 : index
    %c0_62 = arith.constant 0 : index
    %c0_63 = arith.constant 0 : index
    %91 = vector.load %arg18[%c0_61, %c0_62, %c0_63] : memref<1x16x8xf32, #tpu.memory_space<vmem>>, vector<1x16x8xf32>
    %92 = vector.shape_cast %91 : vector<1x16x8xf32> to vector<16x8xf32>
    %93 = vector.broadcast %59 : vector<1x8xf32> to vector<16x8xf32>
    %94 = arith.mulf %92, %93 : vector<16x8xf32>
    %95 = vector.extract_strided_slice %79 {offsets = [0, 128], sizes = [16, 8], strides = [1, 1]} : vector<16x152xf32> to vector<16x8xf32>
    %96 = arith.addf %94, %95 : vector<16x8xf32>
    %c0_64 = arith.constant 0 : index
    %c0_65 = arith.constant 0 : index
    %c0_66 = arith.constant 0 : index
    %97 = vector.load %arg18[%c0_64, %c0_65, %c0_66] : memref<1x16x8xf32, #tpu.memory_space<vmem>>, vector<1x16x8xf32>
    %98 = vector.shape_cast %97 : vector<1x16x8xf32> to vector<16x8xf32>
    %99 = vector.shape_cast %96 : vector<16x8xf32> to vector<1x16x8xf32>
    tpu.vector_store %arg18[%c0_64, %c0_65, %c0_66], %99 {strides = array<i32>} : memref<1x16x8xf32, #tpu.memory_space<vmem>>, vector<1x16x8xf32>,
    %c0_67 = arith.constant 0 : index
    %c0_68 = arith.constant 0 : index
    %c0_69 = arith.constant 0 : index
    %100 = vector.load %arg20[%c0_67, %c0_68, %c0_69] : memref<1x16x16xf32, #tpu.memory_space<vmem>>, vector<1x16x16xf32>
    %101 = vector.shape_cast %100 : vector<1x16x16xf32> to vector<16x16xf32>
    %102 = vector.extract_strided_slice %79 {offsets = [0, 136], sizes = [16, 16], strides = [1, 1]} : vector<16x152xf32> to vector<16x16xf32>
    %103 = arith.addf %101, %102 : vector<16x16xf32>
    %c0_70 = arith.constant 0 : index
    %c0_71 = arith.constant 0 : index
    %c0_72 = arith.constant 0 : index
    %104 = vector.load %arg20[%c0_70, %c0_71, %c0_72] : memref<1x16x16xf32, #tpu.memory_space<vmem>>, vector<1x16x16xf32>
    %105 = vector.shape_cast %104 : vector<1x16x16xf32> to vector<16x16xf32>
    %106 = vector.shape_cast %103 : vector<16x16xf32> to vector<1x16x16xf32>
    tpu.vector_store %arg20[%c0_70, %c0_71, %c0_72], %106 {strides = array<i32>} : memref<1x16x16xf32, #tpu.memory_space<vmem>>, vector<1x16x16xf32>,
    return
  }
  func.func @transform_0(%arg0: i32, %arg1: i32) -> (i32, i32) {
    %c2_i32 = arith.constant 2 : i32
    %0 = arith.muli %arg0, %c2_i32 : i32
    %1 = arith.addi %0, %arg1 : i32
    %c0_i32 = arith.constant 0 : i32
    %c0_i32_0 = arith.constant 0 : i32
    return %1, %c0_i32 : i32, i32
  }
  func.func @transform_1(%arg0: i32, %arg1: i32) -> (i32, i32) {
    %c2_i32 = arith.constant 2 : i32
    %0 = arith.muli %arg0, %c2_i32 : i32
    %1 = arith.addi %0, %arg1 : i32
    %c0_i32 = arith.constant 0 : i32
    %c0_i32_0 = arith.constant 0 : i32
    return %1, %c0_i32 : i32, i32
  }
  func.func @transform_2(%arg0: i32, %arg1: i32) -> (i32, i32) {
    %c2_i32 = arith.constant 2 : i32
    %0 = arith.muli %arg0, %c2_i32 : i32
    %1 = arith.addi %0, %arg1 : i32
    %c0_i32 = arith.constant 0 : i32
    %c0_i32_0 = arith.constant 0 : i32
    return %1, %c0_i32 : i32, i32
  }
  func.func @transform_3(%arg0: i32, %arg1: i32) -> (i32, i32) {
    %c0_i32 = arith.constant 0 : i32
    %c0_i32_0 = arith.constant 0 : i32
    %c0_i32_1 = arith.constant 0 : i32
    return %c0_i32, %c0_i32_0 : i32, i32
  }
  func.func @transform_4(%arg0: i32, %arg1: i32) -> (i32, i32) {
    %c0_i32 = arith.constant 0 : i32
    %c0_i32_0 = arith.constant 0 : i32
    %c0_i32_1 = arith.constant 0 : i32
    return %c0_i32, %c0_i32_0 : i32, i32
  }
  func.func @transform_5(%arg0: i32, %arg1: i32) -> (i32, i32) {
    %c0_i32 = arith.constant 0 : i32
    %c0_i32_0 = arith.constant 0 : i32
    %c0_i32_1 = arith.constant 0 : i32
    return %c0_i32, %c0_i32_0 : i32, i32
  }
  func.func @transform_6(%arg0: i32, %arg1: i32) -> (i32, i32) {
    %c0_i32 = arith.constant 0 : i32
    %c0_i32_0 = arith.constant 0 : i32
    %c0_i32_1 = arith.constant 0 : i32
    return %c0_i32, %c0_i32_0 : i32, i32
  }
  func.func @transform_7(%arg0: i32, %arg1: i32) -> (i32, i32) {
    %c0_i32 = arith.constant 0 : i32
    %c0_i32_0 = arith.constant 0 : i32
    %c0_i32_1 = arith.constant 0 : i32
    return %c0_i32, %c0_i32_0 : i32, i32
  }
  func.func @transform_8(%arg0: i32, %arg1: i32) -> (i32, i32) {
    %c0_i32 = arith.constant 0 : i32
    %c0_i32_0 = arith.constant 0 : i32
    %c0_i32_1 = arith.constant 0 : i32
    return %c0_i32, %c0_i32_0 : i32, i32
  }
  func.func @transform_9(%arg0: i32, %arg1: i32) -> (i32, i32) {
    %c0_i32 = arith.constant 0 : i32
    %c0_i32_0 = arith.constant 0 : i32
    %c0_i32_1 = arith.constant 0 : i32
    return %c0_i32, %c0_i32_0 : i32, i32
  }
  func.func @transform_10(%arg0: i32, %arg1: i32) -> (i32, i32) {
    %c0_i32 = arith.constant 0 : i32
    %c0_i32_0 = arith.constant 0 : i32
    %c0_i32_1 = arith.constant 0 : i32
    return %c0_i32, %c0_i32_0 : i32, i32
  }
  func.func @transform_11(%arg0: i32, %arg1: i32) -> (i32, i32) {
    %c0_i32 = arith.constant 0 : i32
    %c0_i32_0 = arith.constant 0 : i32
    %c0_i32_1 = arith.constant 0 : i32
    return %c0_i32, %c0_i32_0 : i32, i32
  }
  func.func @transform_12(%arg0: i32, %arg1: i32) -> (i32, i32) {
    %c0_i32 = arith.constant 0 : i32
    %c0_i32_0 = arith.constant 0 : i32
    %c0_i32_1 = arith.constant 0 : i32
    return %c0_i32, %c0_i32_0 : i32, i32
  }
  func.func @transform_13(%arg0: i32, %arg1: i32) -> (i32, i32) {
    %c0_i32 = arith.constant 0 : i32
    %c0_i32_0 = arith.constant 0 : i32
    %c0_i32_1 = arith.constant 0 : i32
    return %c0_i32, %c0_i32_0 : i32, i32
  }
  func.func @transform_14(%arg0: i32, %arg1: i32) -> (i32, i32) {
    %c0_i32 = arith.constant 0 : i32
    %c0_i32_0 = arith.constant 0 : i32
    %c0_i32_1 = arith.constant 0 : i32
    return %c0_i32, %c0_i32_0 : i32, i32
  }
  func.func @transform_15(%arg0: i32, %arg1: i32) -> (i32, i32, i32) {
    %c0_i32 = arith.constant 0 : i32
    %c0_i32_0 = arith.constant 0 : i32
    %c0_i32_1 = arith.constant 0 : i32
    return %arg0, %c0_i32, %c0_i32_0 : i32, i32, i32
  }
  func.func @transform_16(%arg0: i32, %arg1: i32) -> (i32, i32, i32) {
    %c0_i32 = arith.constant 0 : i32
    %c0_i32_0 = arith.constant 0 : i32
    %c0_i32_1 = arith.constant 0 : i32
    return %arg0, %c0_i32, %c0_i32_0 : i32, i32, i32
  }
  func.func @transform_17(%arg0: i32, %arg1: i32) -> (i32, i32, i32) {
    %c0_i32 = arith.constant 0 : i32
    %c0_i32_0 = arith.constant 0 : i32
    %c0_i32_1 = arith.constant 0 : i32
    return %arg0, %c0_i32, %c0_i32_0 : i32, i32, i32
  }
  func.func @transform_18(%arg0: i32, %arg1: i32) -> (i32, i32, i32) {
    %c0_i32 = arith.constant 0 : i32
    %c0_i32_0 = arith.constant 0 : i32
    %c0_i32_1 = arith.constant 0 : i32
    return %arg0, %c0_i32, %c0_i32_0 : i32, i32, i32
  }
}

</mosaic_0001>

<bundles_post_ra>
// kernel: tpu_custom_call.1
= control target key start
LH: loop header
LB: loop body
LE: loop exit
PB: predicated region body
PF: predicated region fallthrough
CT: control target
= control target key end

     0   :  { %s2209_s0 = inlined_call_operand.vmem [shape: s32[32,1], index: 0, kind: input, shape index: {}]   ;;  %s2210_s1 = inlined_call_operand.vmem [shape: s32[32,1], index: 1, kind: input, shape index: {}]   ;;  %s2211_s2 = inlined_call_operand.vmem [shape: s32[32,1], index: 2, kind: input, shape index: {}]   ;;  %s2212_s3 = inlined_call_operand.vmem [shape: bf16[16,32], index: 3, kind: input, shape index: {}]   ;;  %s2213_s4 = inlined_call_operand.vmem [shape: bf16[6,16], index: 4, kind: input, shape index: {}]   ;;  %s2214_s5 = inlined_call_operand.vmem [shape: bf16[32,128], index: 5, kind: input, shape index: {}]   ;;  %s2215_s6 = inlined_call_operand.vmem [shape: bf16[32,128], index: 6, kind: input, shape index: {}]   ;;  %s2216_s7 = inlined_call_operand.vmem [shape: bf16[16,128], index: 7, kind: input, shape index: {}]   ;;  %s2217_s8 = inlined_call_operand.vmem [shape: f32[1,128], index: 8, kind: input, shape index: {}]   ;;  %s2218_s9 = inlined_call_operand.vmem [shape: f32[1,128], index: 9, kind: input, shape index: {}]   ;;  %s2219_s10 = inlined_call_operand.vmem [shape: bf16[32,128], index: 10, kind: input, shape index: {}]   ;;  %s2220_s11 = inlined_call_operand.vmem [shape: bf16[16,128], index: 11, kind: input, shape index: {}]   ;;  %s2221_s12 = inlined_call_operand.vmem [shape: f32[1,128], index: 12, kind: input, shape index: {}]   ;;  %s2222_s13 = inlined_call_operand.vmem [shape: bf16[128,8], index: 13, kind: input, shape index: {}]   ;;  %s2223_s14 = inlined_call_operand.vmem [shape: f32[8,128], index: 14, kind: input, shape index: {}]   ;;  %s2224_s15 = inlined_call_operand.hbm [shape: f32[2,16,128], index: 15, kind: output, shape index: {0}]   ;;  %s2225_s16 = inlined_call_operand.vmem [shape: f32[2,16,8], index: 16, kind: output, shape index: {1}]   ;;  %s2226_s17 = inlined_call_operand.hbm [shape: f32[2,1,8], index: 17, kind: output, shape index: {2}]   ;;  %s2227_s18 = inlined_call_operand.hbm [shape: f32[2,16,16], index: 18, kind: output, shape index: {3}]  }
   0x1   :  { %2248 = sst [smem:[#allocation21_spill]] %s2209_s0 }
   0x2   :  { %2249 = sst [smem:[#allocation22_spill]] %s2210_s1 }
   0x3   :  { %2250 = sst [smem:[#allocation23_spill]] %s2211_s2 }
   0x4   :  { %2251 = sst [smem:[#allocation24_spill]] %s2218_s9 }
   0x5   :  { %2252 = sst [smem:[#allocation25_spill]] %s2221_s12 }
   0x6   :  { %2253 = sst [smem:[#allocation26_spill]] %s2223_s14 }
   0x7   :  { %2254 = sst [smem:[#allocation27_spill]] %s2224_s15 }
   0x8   :  { %2255 = sst [smem:[#allocation28_spill]] %s2226_s17 }
   0x9   :  { %2256 = sst [smem:[#allocation29_spill]] %s2227_s18 }
   0xa   :  { %24 = vsyncpa [#allocation3], 0 }
   0xb   :  { %26 = vsyncpa [#allocation3 + $0x1], 0 }
   0xc   :  { %27 = vsyncpa [#allocation5], 0 }
   0xd   :  { %29 = vsyncpa [#allocation5 + $0x1], 0  ;;  %s1906_s27 = smov 0   ;;  %s1908_s28 = smov 0  }
   0xe   :  { %s1910_s29 = smov 0   ;;  %s1912_s30 = smov 0  }
   0xf   :  { %s1914_s0 = smov 0   ;;  %s1916_s19 = smov 0  }
  0x10   :  { %s1918_s1 = smov 0   ;;  %s1920_s20 = smov 0  }
  0x11 LB: > { %2257 = sst [smem:[#allocation9_spill]] %s1775_s27  ;;  %s2228_s21 = sadd.s32 4294967295, %s1803_s20   ;;  %s1803_s20 = sphi %s1920_s20, %s35_s20   ;;  %s1799_s1 = sphi %s1918_s1, %s2296_s1   ;;  %s1795_s19 = sphi %s1916_s19, %s2295_s19   ;;  %s1791_s0 = sphi %s1914_s0, %s2294_s0   ;;  %s1787_s30 = sphi %s1912_s30, %s2293_s30   ;;  %s1783_s29 = sphi %s1910_s29, %s2292_s29   ;;  %s1779_s28 = sphi %s1908_s28, %s2291_s28   ;;  %s1775_s27 = sphi %s1906_s27, %s2290_s27  }
  0x12   : > { %2258 = sst [smem:[#allocation10_spill]] %s1779_s28  ;;  %s2229_s22 = sadd.s32 4294967294, %s1803_s20  }
  0x13   : > { %2259 = sst [smem:[#allocation11_spill]] %s1783_s29  ;;  %s44_s2 = sadd.s32 1, %s1795_s19 }
  0x14   : > { %2260 = sst [smem:[#allocation12_spill]] %s1791_s0  ;;  %p45_p0 = scmp.ge.s32.totalorder %s44_s2, 2 }
  0x15   : > { %2261 = sst [smem:[#allocation13_spill]] %s1795_s19  ;;  %s47_s23 = sadd.s32 1, %s1799_s1 }
  0x16   : > { %2262 = sst [smem:[#allocation14_spill]] %s1799_s1  ;;  %p406_p1 = scmp.ne.s32.totalorder %s1783_s29, %s1779_s28 }
  0x17   : > { %2263 = sst [smem:[#allocation15_spill]] %s1803_s20  ;;  %p407_p2 = scmp.eq.s32.totalorder %s2228_s21, 3 }
  0x18   : > { %s2298_s2 = smov (%p45_p0, %s44_s2), 0  ;;  %s2300_s23 = smov (!%p45_p0, %s47_s23), %s1799_s1 }
  0x19   : > { %2264 = sst [smem:[#allocation16_spill]] %s2298_s2  ;;  %p1957_p3 = por %p407_p2, %p406_p1 }
  0x1a   : > { %p412_p4 = scmp.ne.s32.totalorder %s1779_s28, %s1775_s27  ;;  %p49_p5 = scmp.ge.s32.totalorder %s2300_s23, 2 }
  0x1b   : > { %s2265_s24 = scalar_select %p1957_p3, 1, 0 }
  0x1c   : > { %p413_p6 = scmp.eq.s32.totalorder %s2229_s22, 3  ;;  %p1434_p7 = scmp.ge.s32.totalorder %s1803_s20, 1 }
  0x1d   : > { %2266 = sst [smem:[#allocation17_spill]] %s2265_s24  ;;  %p578_p8 = scmp.lt.s32.totalorder %s1803_s20, 5 }
  0x1e   : > { %s2302_s23 = smov (%p49_p5, %s2300_s23), 0  ;;  %p1969_p9 = por %p413_p6, %p412_p4 }
  0x1f   : > { %2267 = sst [smem:[#allocation18_spill]] %s2302_s23  ;;  %p579_p10 = pnand %p1434_p7, %p578_p8 }
  0x20   : > { %s2268_s25 = scalar_select %p1969_p9, 1, 0 }
  0x21   : > { %s393_s26 = ssub.s32 %s1799_s1, %s2302_s23  ;;  %s396_s21 = sadd.s32 1, %s1783_s29 }
  0x22   : > { %2269 = sst [smem:[#allocation19_spill]] %s2268_s25  ;;  %p394_p11 = scmp.eq.s32.totalorder %s393_s26, 0 }
  0x23   : > { %582 = sbr.rel (%p579_p10) target bundleno = 918 (0x396), region = 80  ;;  %s1980_s22 = sand.u32 (!%p579_p10), 1, %s1779_s28  }
  0x24   : > { %s1977_s2 = scalar_select %p394_p11, %s1783_s29, %s396_s21  }
  0x25   : > { %s1437_s19 = sshll.u32 (!%p579_p10), %s1791_s0, 1  ;;  %s1435_s27 = sshll.u32 (!%p579_p10), %s1980_s22, 4 }
  0x26   : > { %2270 = sst [smem:[#allocation20_spill]] %s1977_s2  ;;  %s660_s15 = sadd.s32 (!%p579_p10), %s1787_s30, %s1437_s19 }
  0x27   : > { %p683_p12 = scmp.lt.s32.totalorder (!%p579_p10), %s1791_s0, 1  ;;  %p661_p13 = scmp.lt.s32.totalorder (!%p579_p10), %s660_s15, 3 }
  0x28   : > { %s2271_s18 = sld [smem:[#allocation21_spill]]  ;;  %s2006_s9 = scalar_lea.vmem [#allocation2], %s1435_s27 }
  0x29   : > { %s684_s23 = scalar_select %p683_p12, %s1791_s0, 1 }
  0x2a   : > { %s2304_s15 = smov (!%p661_p13, %s660_s15), 3  ;;  %s2272_s20 = sld [smem:[#allocation22_spill]] }
  0x2b   : > { %s1533_s26 = sshll.u32 %s684_s23, 4  ;;  %s1987_s21 = sshll.u32 %s2304_s15, 3 }
  0x2c   : > { %s1992_s29 = scalar_lea.vmem %s2225_s16, %s1533_s26  ;;  %s2273_s15 = sld [smem:[#allocation23_spill]] }
  0x2d   : > { %s2009_s1 = scalar_lea.vmem [#allocation4], %s1980_s22  ;;  %s2011_s2 = scalar_lea.vmem [#allocation6], %s1435_s27 }
  0x2e   : > { %s664_s24 = scalar_lea.vmem %s2271_s18, %s1987_s21  ;;  %p1445_p0 = scmp.ne.s32.totalorder %s1787_s30, 0 }
  0x30   : > { %s672_s0 = scalar_lea.vmem %s2272_s20, %s1987_s21  ;;  %692 = sbr.rel (%p1445_p0) target bundleno = 61 (0x3d), region = 84 }
  0x32   : > { %s680_s14 = scalar_lea.vmem %s2273_s15, %s1987_s21 }
  0x35   : > { %vm695_vm0 = vcmask 64512   ;;  %v1805_v0 = vmov 0.0   ;;  %vm698_vm1 = vcmask 57344   ;;  %vm700_vm2 = vcmask 130048  }
  0x36   : > { %693 = vst [vmem:[%s2006_s9] sm:$0xff] %v1805_v0 }
  0x37   : > { %694 = vst [vmem:[%s2006_s9 + $0x8] sm:$0xff] %v1805_v0 }
  0x38   : > { %696 = vst.msk [vmem:[%s1992_s29] sm:$0xff] %vm695_vm0, %v1805_v0 }
  0x39   : > { %697 = vst.msk [vmem:[%s1992_s29 + $0x8] sm:$0xff] %vm695_vm0, %v1805_v0 }
  0x3a   : > { %699 = vst.msk [vmem:[%s2009_s1] sm:$0x1] %vm698_vm1, %v1805_v0 }
  0x3b   : > { %701 = vst.msk [vmem:[%s2011_s2] sm:$0xff] %vm700_vm2, %v1805_v0 }
  0x3c   : > { %702 = vst.msk [vmem:[%s2011_s2 + $0x8] sm:$0xff] %vm700_vm2, %v1805_v0 }
  0x3d PF: > { %v703_v1 = vld [vmem:[%s664_s24] sm:$0xff]  ;;  %v1806_v3 = vmov 0   ;;  %vm764_vm3 = vcmask 1042432   ;;  %v1536_v7 = vld [vmem:[%s2214_s5 + $0x8] sm:$0xff]  ;;  %v705_v9 = vlaneseq  ;;  %v1807_v13 = vmov 0.0   ;;  %s2246_s28 = smov 8  }
  0x3e   : > { %v719_v2 = vld [vmem:[%s680_s14] sm:$0xff]  ;;  %1640 = vset.pattern.permute.xlu0 %v1806_v3  ;;  %1641 = vset.pattern.permute.xlu1 %v1806_v3  ;;  %vm760_vm6 = vcmask 48128   ;;  %vm739_vm8 = vcmask 130048   ;;  %v1538_v25 = vld [vmem:[%s2215_s6 + $0x8] sm:$0xff]  ;;  %v1547_v33 = vld [vmem:[%s2222_s13 + $0x38] sm:$0xff]  ;;  %vm802_vm9 = vcmask 261120  }
  0x3f   : > { %708 = vperm.xlu0 %1640, %v703_v1   ;;  %721 = vperm.xlu1 %1641, %v719_v2   ;;  %v704_v4 = vld [vmem:[%s672_s0] sm:$0xff]  ;;  %v706_v10 = vand.u32 127, %v705_v9  ;;  %v1549_v28 = vld [vmem:[%s2219_s10 + $0x8] sm:$0xff]  ;;  %v1546_v35 = vld [vmem:[%s2222_s13 + $0x30] sm:$0xff]  ;;  %s2274_s25 = sld [smem:[#allocation24_spill]]  ;;  %vm964_vm11 = vcmask 64512  }
  0x40   : > { %v1534_v5 = vld [vmem:[%s2212_s3] sm:$0xff]  ;;  %840 = vmatpush.bf16.msra.mxu3 %v1536_v7  ;;  %812 = vmatpush.bf16.msra.mxu2 %v1538_v25  ;;  %v1545_v40 = vld [vmem:[%s2222_s13 + $0x28] sm:$0xff]  ;;  %v1543_v42 = vld [vmem:[%s2222_s13 + $0x18] sm:$0xff]  ;;  %s2275_s19 = sld [smem:[#allocation26_spill]]  ;;  %vm976_vm12 = vcmask 57344   ;;  %vm1090_vm13 = vcmask 1043456  }
  0x41   : > { %750 = vmatpush.bf16.msra.mxu0 %v1534_v5  ;;  %v759_v6 = vld [vmem:[%s2213_s4] sm:$0x7]  ;;  %v1542_v43 = vld [vmem:[%s2222_s13 + $0x10] sm:$0xff]  ;;  %v1541_v44 = vld [vmem:[%s2222_s13 + $0x8] sm:$0xff]  ;;  %s2276_s12 = sld [smem:[#allocation25_spill]]  ;;  %s1809_s27 = smov 120  }
  0x42   : > { %v766_v8 = vsel %vm764_vm3, %v759_v6, 0  ;;  %v1535_v24 = vld [vmem:[%s2214_s5] sm:$0xff]  ;;  %s2277_s17 = sld [smem:[#allocation12_spill]] }
  0x43   : > { %775 = vmatpush.bf16.msra.mxu1 %v766_v8  ;;  %v1537_v26 = vld [vmem:[%s2215_s6] sm:$0xff]  ;;  %s2278_s18 = sld [smem:[#allocation15_spill]] }
  0x44   : > { %841 = vmatpush.bf16.msra.mxu3 %v1535_v24  ;;  %v1539_v27 = vld [vmem:[%s2216_s7] sm:$0xff]  ;;  %813 = vmatpush.bf16.msra.mxu2 %v1537_v26  ;;  %s2279_s0 = sld [smem:[#allocation28_spill]] }
  0x45   : > { %865 = vmatpush.bf16.msrb.mxu0 %v1539_v27  ;;  %v1548_v29 = vld [vmem:[%s2219_s10] sm:$0xff] }
  0x46   : > { %v1550_v30 = vld [vmem:[%s2220_s11] sm:$0xff] }
  0x47   : > { %711 = vperm.xlu0 %1640, %v704_v4   ;;  %950 = vmatpush.bf16.msrb.mxu1 %v1547_v33  ;;  %v1544_v41 = vld [vmem:[%s2222_s13 + $0x20] sm:$0xff] }
  0x48   : > { %1027 = vmatpush.bf16.msrb.mxu3 %v1549_v28  ;;  %1003 = vmatpush.bf16.msrb.mxu2 %v1550_v30  ;;  %v1540_v46 = vld [vmem:[%s2222_s13] sm:$0xff] }
  0x49   : > { %v1642_v52 = vld [vmem:[%s2217_s8] ss:$0 sm:$0xff]  ;;  %s2282_s26 = sadd.s32 4294967295, %s2278_s18  }
  0x4a   : > { %v1643_v55 = vld [vmem:[%s2274_s25] ss:$0 sm:$0xff]  ;;  %s2280_s24 = smov %s2279_s0  ;;  %s1225_s25 = scalar_lea.hbm %s2279_s0, %s2277_s17 }
  0x4b   : > { %951 = vmatpush.bf16.msrb.mxu1 %v1546_v35  ;;  %v1039_v2 = vld [vmem:[%s2275_s19] sm:$0xff]  ;;  %s2109_s21 = sand.u32 1, %s2282_s26   ;;  %s1227_s19 = sshll.u32 %s2009_s1, 4  ;;  %s1228_s19 = int_to_ptr.vmem [resolvable:$true] %s1227_s19 }
  0x4c   : > { %1028 = vmatpush.bf16.msrb.mxu3 %v1548_v29  ;;  %v1644_v26 = vld [vmem:[%s2276_s12] ss:$0 sm:$0xff]  ;;  %s1229_s23 = sshll.u32 %s1225_s25, 4  ;;  %s1192_s15 = scalar_lea.sflag [#allocation5], %s2109_s21  ;;  %s1230_s23 = int_to_ptr.hbm [resolvable:$true] %s1229_s23 }
  0x4d   : > { %v1157_v33 = vld [vmem:[%s1992_s29] sm:$0xff]  ;;  %s1663_s12 = sshra.s32 %s1230_s23, 4  ;;  %s1669_s14 = scalar_lea.hbm %s2280_s24, 2  ;;  %s1664_s12 = int_to_ptr.hbm [resolvable:$true] %s1663_s12 }
  0x4e   : > { %p1670_p5 = scmp.lt.s32.totalorder %s1664_s12, %s2280_s24 }
  0x4f   : > { %952 = vmatpush.bf16.msrb.mxu1 %v1545_v40 }
  0x53   : > { %953 = vmatpush.bf16.msrb.mxu1 %v1544_v41 }
  0x57   : > { %954 = vmatpush.bf16.msrb.mxu1 %v1543_v42 }
  0x5b   : > { %955 = vmatpush.bf16.msrb.mxu1 %v1542_v43 }
  0x5f   : > { %956 = vmatpush.bf16.msrb.mxu1 %v1541_v44 }
  0x63   : > { %957 = vmatpush.bf16.msrb.mxu1 %v1540_v46 }
  0xb1   : > { %v709_v11 = vpop.permute.xlu0 %708  ;;  %v722_v12 = vpop.permute.xlu1 %721 }
  0xb2   : > { %vm713_vm4 = vcmp.eq.s32.totalorder %v706_v10, %v709_v11  ;;  %vm723_vm5 = vcmp.eq.s32.totalorder %v706_v10, %v722_v12  ;;  %v963_v11 = vld [vmem:[%s2009_s1] sm:$0x1] }
  0xb3   : > { %v715_v14 = vsel %vm713_vm4, 1.0, %v1807_v13  ;;  %v724_v15 = vsel %vm723_vm5, 1.0, %v1807_v13 }
  0xb4   : > { %v717_v16 = vpack.c.bf16 %v715_v14, %v715_v14  ;;  %v725_v17 = vpack.c.bf16 %v724_v15, %v724_v15 }
  0xb6   : > { %1071 = vxpose.xlu2.c.b16.start.end [1/1] (short) (narrow) %v717_v16, 16  ;;  %1451 = vmatmul.msk.bf16.vlgmr.msra.gmra.mxu1 %vm760_vm6, %v725_v17  ;;  %v730_v21 = vunpack.c.l.b16 %v717_v16 }
  0xb9   : > { %v712_v18 = vpop.permute.xlu0 %711 }
  0xba   : > { %vm714_vm7 = vcmp.eq.s32.totalorder %v706_v10, %v712_v18 }
  0xbb   : > { %v716_v19 = vsel %vm714_vm7, 1.0, %v1807_v13 }
  0xbc   : > { %v718_v20 = vpack.c.bf16 %v716_v19, %v716_v19 }
  0xbe   : > { %v731_v22 = vunpack.c.l.b16 %v718_v20 }
  0xc0   : > { %v732_v23 = vpack.c.b16 %v731_v22, %v730_v21 }
  0xc2   : > { %1450 = vmatmul.msk.bf16.vlgmr.msra.gmra.mxu0 %vm739_vm8, %v732_v23 }
  0xc3   : > { %1058 = vmatpush.msra.mxu0 %v1039_v2 }
 0x133   : > { %v777_v31 = vpop.f32.mrf.mxu1 }
 0x134   : > { %v781_v32 = vpack.c.bf16 %v777_v31, %v777_v31  ;;  %1065 = vrot.lane.b32.xlu1 %v777_v31, %s2246_s28  ;;  %s1665_s28 = scalar_lea.hbm %s1664_s12, 1 }
 0x135   : > { %p1666_p1 = scmp.ne.s32.totalorder %s1664_s12, %s1665_s28  ;;  %p1671_p6 = scmp.lt.s32.totalorder %s1669_s14, %s1665_s28 }
 0x136   : > { %1474 = vmatmul.msk.bf16.vlgmr.msrb.gmra.mxu0 %vm739_vm8, %v781_v32 }
 0x137   : > { %1145 = vmatpush.msrb.mxu0 %v1039_v2  ;;  %p1667_p2 = pnand %p1666_p1, %p1957_p3  ;;  %p1672_p7 = por %p1671_p6, %p1670_p5 }
 0x139   : > { %p1668_p4 = pneg %p1667_p2 }
 0x13b   : > { %v779_v34 = vpop.f32.mrf.mxu1  ;;  %p1673_p8 = pnand %p1672_p7, %p1668_p4 }
 0x13f   : > { %v752_v36 = vpop.f32.mrf.mxu0 }
 0x140   : > { %v757_v37 = vpack.c.bf16 %v752_v36, %v752_v36 }
 0x142   : > { %1469 = vmatmul.msk.bf16.vlgmr.msra.gmra.mxu3 %vm802_vm9, %v757_v37  ;;  %v1158_v37 = vld [vmem:[%s1992_s29 + $0x8] sm:$0xff] }
 0x147   : > { %v754_v38 = vpop.f32.mrf.mxu0 }
 0x148   : > { %v758_v39 = vpack.c.bf16 %v754_v38, %v754_v38 }
 0x14a   : > { %1460 = vmatmul.msk.bf16.vlgmr.msra.gmra.mxu2 %vm802_vm9, %v758_v39 }
 0x152   : > { %1520 = vmatmul.msk.bf16.vlgmr.msrb.gmra.mxu3 %vm802_vm9, %v758_v39 }
 0x157   : > { %v1079_v24 = vpop.trf.xlu2 }
 0x15a   : > { %1511 = vmatmul.msk.bf16.vlgmr.msrb.gmra.mxu2 %vm739_vm8, %v781_v32 }
 0x1a6   : > { %v1066_v20 = vpop.permute.xlu1 %1065 }
 0x1b3   : > { %v867_v45 = vpop.f32.mrf.mxu0 }
 0x1bb   : > { %v869_v47 = vpop.f32.mrf.mxu0 }
 0x1c5   : > { %v843_v48 = vpop.f32.mrf.mxu3 }
 0x1cd   : > { %v815_v49 = vpop.f32.mrf.mxu2  ;;  %v845_v50 = vpop.f32.mrf.mxu3 }
 0x1ce   : > { %v844_v51 = vadd.f32 %v843_v48, %v815_v49 }
 0x1d0   : > { %v871_v53 = vadd.f32 %v867_v45, %v844_v51 }
 0x1d2   : > { %v876_v54 = vadd.f32 %v1642_v52, %v871_v53 }
 0x1d4   : > { %v878_v56 = vmul.f32 0.2, %v876_v54  ;;  %vm877_vm10 = vcmp.gt.f32.partialorder %v876_v54, 0.0 }
 0x1d5   : > { %v817_v57 = vpop.f32.mrf.mxu2  ;;  %v1030_v58 = vpop.f32.mrf.mxu3 }
 0x1d6   : > { %v879_v59 = vsel %vm877_vm10, %v876_v54, %v878_v56 }
 0x1d7   : > { %v884_v60 = vmul.f32 %v1643_v55, %v879_v59 }
 0x1d9   : > { %v885_v61 = vpack.c.bf16 %v884_v60, %v884_v60 }
 0x1db   : > { %958 = vmatmul.bf16.vlgmr.msrb.gmra.mxu1 %v885_v61 }
 0x1dd   : > { %v1005_v62 = vpop.f32.mrf.mxu2  ;;  %v1032_v63 = vpop.f32.mrf.mxu3 }
 0x1de   : > { %v1031_v0 = vadd.f32 %v1030_v58, %v1005_v62 }
 0x1e0   : > { %v1038_v27 = vadd.f32 %v1644_v26, %v1031_v0 }
 0x1e5   : > { %v1007_v1 = vpop.f32.mrf.mxu2 }
 0x258   : > { %v959_v3 = vpop.f32.mrf.mxu1 }
 0x259   : > { %v965_v4 = vsel %vm964_vm11, %v959_v3, -inf }
 0x25a   : > { %v966_v5 = vrot.slane %v965_v4, 4 }
 0x25c   : > { %v967_v6 = vmax.f32 %v965_v4, %v966_v5 }
 0x25e   : > { %v968_v7 = vrot.slane %v967_v6, 2 }
 0x260   : > { %v969_v8 = vmax.f32 %v967_v6, %v968_v7  ;;  %v961_v9 = vpop.f32.mrf.mxu1 }
 0x262   : > { %v970_v10 = vrot.slane %v969_v8, 1 }
 0x264   : > { %v971_v12 = vmax.f32 %v969_v8, %v970_v10 }
 0x266   : > { %v972_v13 = vmax.f32 %v963_v11, %v971_v12 }
 0x268   : > { %v979_v14 = vperm.slane %v972_v13, 0  ;;  %977 = vst.msk [vmem:[%s2009_s1] sm:$0x1] %vm976_vm12, %v972_v13  ;;  %v973_v17 = vsub.f32 %v963_v11, %v972_v13 }
 0x26a   : > { %v981_v15 = vsub.f32 %v959_v3, %v979_v14  ;;  %v974_v18 = vmul.f32 1.442695, %v973_v17 }
 0x26c   : > { %v982_v16 = vmul.f32 1.442695, %v981_v15 }
 0x26e   : > { %1645 = vpow2.f32 %v982_v16 }
 0x26f   : > { %1647 = vpow2.f32 %v974_v18 }
 0x274   : > { %v1646_v19 = vpop.eup %1645 }
 0x275   : > { %1521 = vmatmul.msk.f32.vlgmr.msra.gmra.mxu0 %vm964_vm11, %v1646_v19  ;;  %v1068_v21 = vsel %vm964_vm11, %v1646_v19, %v1066_v20  ;;  %v1648_v25 = vpop.eup %1647 }
 0x276   : > { %v1070_v22 = vpack.c.bf16 %v1068_v21, %v1068_v21  ;;  %v1159_v32 = vperm.slane %v1648_v25, 0 }
 0x278   : > { %v1095_v23 = vsel %vm1090_vm13, %v1070_v22, 0  ;;  %v1161_v34 = vmul.f32 %v1159_v32, %v1157_v33  ;;  %v1162_v38 = vmul.f32 %v1159_v32, %v1158_v37 }
 0x279   : > { %1118 = vmatpush.bf16.msra.mxu3 %v1095_v23 }
 0x27c   : > { %1523 = vmatmul.msk.bf16.vlgmr.msra.gmra.mxu3 %vm964_vm11, %v1079_v24 }
 0x27d   : > { %1524 = vmatmul.msk.f32.vlgmr.msrb.gmra.mxu0 %vm964_vm11, %v1648_v25 }
 0x2f2   : > { %v1060_v28 = vpop.f32.mrf.mxu0 }
 0x2f3   : > { %v1063_v29 = vmul.f32 %v1060_v28, %v1038_v27 }
 0x2f5   : > { %v1069_v30 = vpack.c.bf16 %v1063_v29, %v1063_v29 }
 0x2f7   : > { %v1092_v31 = vsel %vm1090_vm13, %v1069_v30, 0 }
 0x2f8   : > { %1104 = vmatpush.bf16.msra.mxu2 %v1092_v31 }
 0x2fb   : > { %1522 = vmatmul.msk.bf16.vlgmr.msra.gmra.mxu2 %vm964_vm11, %v1079_v24 }
 0x2ff   : > { %v1120_v35 = vpop.f32.mrf.mxu3 }
 0x300   : > { %v1163_v36 = vadd.f32 %v1161_v34, %v1120_v35  ;;  %1171 = vrot.lane.b32.xlu2 %v1120_v35, %s1809_s27 }
 0x302   : > { %1165 = vst.msk [vmem:[%s1992_s29] sm:$0xff] %vm964_vm11, %v1163_v36 }
 0x307   : > { %v1122_v39 = vpop.f32.mrf.mxu3 }
 0x308   : > { %v1164_v40 = vadd.f32 %v1162_v38, %v1122_v39  ;;  %1173 = vrot.lane.b32.xlu0 %v1122_v39, %s1809_s27 }
 0x30a   : > { %1166 = vst.msk [vmem:[%s1992_s29 + $0x8] sm:$0xff] %vm964_vm11, %v1164_v40 }
 0x30b   : > { %1676 = shalt.err (!%p1673_p8)
}
 0x30c   : > { %1554 = dma.vmem_to_hbm [thread:$0]  (%p1957_p3), %s1228_s19, 16, %s1230_s23, %s1192_s15   ;;  %v1167_v41 = vld [vmem:[%s2011_s2] sm:$0xff]  ;;  %v1147_v44 = vpop.f32.mrf.mxu0  ;;  %v1168_v45 = vld [vmem:[%s2011_s2 + $0x8] sm:$0xff] }
 0x30d   : > { %s1551_s29 = sshll.u32 %s2277_s17, 4  ;;  %s2283_s25 = sld [smem:[#allocation29_spill]]  ;;  %v1150_v46 = vperm.slane %v1147_v44, 0  ;;  %v1125_v47 = vld [vmem:[%s2006_s9] sm:$0xff] }
 0x30e   : > { %s1241_s18 = sshll.u32 %s2011_s2, 4  ;;  %s1242_s18 = int_to_ptr.vmem [resolvable:$true] %s1241_s18 }
 0x30f   : > { %v1151_v50 = vmul.f32 %v1150_v46, %v1125_v47 }
 0x313   : > { %s1240_s26 = scalar_lea.hbm %s2283_s25, %s1551_s29  ;;  %s1697_s1 = scalar_lea.hbm %s2283_s25, 32 }
 0x314   : > { %s1243_s12 = sshll.u32 %s1240_s26, 4  ;;  %s1244_s12 = int_to_ptr.hbm [resolvable:$true] %s1243_s12 }
 0x315   : > { %s1691_s19 = sshra.s32 %s1244_s12, 4  ;;  %s1692_s19 = int_to_ptr.hbm [resolvable:$true] %s1691_s19 }
 0x316   : > { %s1693_s23 = scalar_lea.hbm %s1692_s19, 16  ;;  %p1698_p13 = scmp.lt.s32.totalorder %s1692_s19, %s2283_s25 }
 0x317   : > { %p1694_p10 = scmp.ne.s32.totalorder %s1692_s19, %s1693_s23  ;;  %p1699_p0 = scmp.lt.s32.totalorder %s1697_s1, %s1693_s23 }
 0x319   : > { %p1695_p11 = pnand %p1694_p10, %p1957_p3  ;;  %p1700_p1 = por %p1699_p0, %p1698_p13 }
 0x31b   : > { %p1696_p12 = pneg %p1695_p11 }
 0x31d   : > { %p1701_p2 = pnand %p1700_p1, %p1696_p12 }
 0x35a   : > { %v1172_v42 = vpop.permute.xlu2 %1171 }
 0x35b   : > { %v1177_v43 = vadd.f32 %v1172_v42, %v1167_v41 }
 0x35d   : > { %1179 = vst.msk [vmem:[%s2011_s2] sm:$0xff] %vm739_vm8, %v1177_v43 }
 0x37a   : > { %v1174_v48 = vpop.permute.xlu0 %1173 }
 0x37b   : > { %v1178_v49 = vadd.f32 %v1174_v48, %v1168_v45 }
 0x37d   : > { %1180 = vst.msk [vmem:[%s2011_s2 + $0x8] sm:$0xff] %vm739_vm8, %v1178_v49 }
 0x37e   : > { %v1106_v51 = vpop.f32.mrf.mxu2 }
 0x37f   : > { %1704 = shalt.err (!%p1701_p2)
}
 0x380   : > { %s1810_s2 = smov 128   ;;  %s2284_s27 = smov 8   ;;  %v1153_v52 = vadd.f32 %v1151_v50, %v1106_v51  ;;  %v1126_v53 = vld [vmem:[%s2006_s9 + $0x8] sm:$0xff] }
 0x381   : > { %1555 = dma.vmem_to_hbm [thread:$0]  (%p1957_p3), %s1242_s18, 256, %s1244_s12, %s1192_s15, %s1810_s2, %s1810_s2, %s2284_s27   ;;  %v1152_v54 = vmul.f32 %v1150_v46, %v1126_v53 }
 0x382   : > { %1155 = vst [vmem:[%s2006_s9] sm:$0xff] %v1153_v52  ;;  %s2285_s23 = sld [smem:[#allocation27_spill]]  ;;  %s1208_s14 = sshll.u32 %s2006_s9, 4  ;;  %s1209_s14 = int_to_ptr.vmem [resolvable:$true] %s1208_s14 }
 0x383   : > { %s1182_s21 = scalar_lea.sflag [#allocation3], %s1980_s22 }
 0x386   : > { %v1108_v55 = vpop.f32.mrf.mxu2 }
 0x387   : > { %v1154_v56 = vadd.f32 %v1152_v54, %v1108_v55 }
 0x388   : > { %s1207_s30 = scalar_lea.hbm %s2285_s23, %s1551_s29  ;;  %s1725_s29 = scalar_lea.hbm %s2285_s23, 32 }
 0x389   : > { %s1210_s1 = sshll.u32 %s1207_s30, 4  ;;  %1156 = vst [vmem:[%s2006_s9 + $0x8] sm:$0xff] %v1154_v56  ;;  %s1211_s1 = int_to_ptr.hbm [resolvable:$true] %s1210_s1 }
 0x38a   : > { %s1719_s0 = sshra.s32 %s1211_s1, 4  ;;  %s1720_s0 = int_to_ptr.hbm [resolvable:$true] %s1719_s0 }
 0x38b   : > { %s1721_s15 = scalar_lea.hbm %s1720_s0, 16  ;;  %p1726_p7 = scmp.lt.s32.totalorder %s1720_s0, %s2285_s23 }
 0x38c   : > { %p1722_p4 = scmp.ne.s32.totalorder %s1720_s0, %s1721_s15  ;;  %p1727_p8 = scmp.lt.s32.totalorder %s1725_s29, %s1721_s15 }
 0x38e   : > { %p1723_p5 = pnand %p1722_p4, %p1957_p3  ;;  %p1728_p10 = por %p1727_p8, %p1726_p7 }
 0x390   : > { %p1724_p6 = pneg %p1723_p5 }
 0x392   : > { %p1729_p11 = pnand %p1728_p10, %p1724_p6 }
 0x394   : > { %1732 = shalt.err (!%p1729_p11)
}
 0x395   : > { %1553 = dma.vmem_to_hbm [thread:$0]  (%p1957_p3), %s1209_s14, 256, %s1211_s1, %s1182_s21, %s1810_s2, %s1810_s2, %s2284_s27  }
 0x396 PF: > { %s2286_s9 = sld [smem:[#allocation15_spill]] }
 0x397   : > { %s2287_s22 = sld [smem:[#allocation9_spill]] }
 0x39c   : > { %p1569_p12 = scmp.ge.s32.totalorder %s2286_s9, 2 }
 0x39d   : > { %s1258_s19 = sand.u32 1, %s2287_s22  }
 0x39e   : > { %p1560_p13 = pnand %p1569_p12, %p1969_p9  ;;  %s1259_s30 = scalar_lea.sflag [#allocation3], %s1258_s19 }
 0x3a0   : > { %p1561_p0 = pneg %p1560_p13 }
 0x3a2   : > { %1766 = dma.done.wait (%p1561_p0), %s1259_s30, 256  }
 0x3a3   : > { %1768 = vsyncadd (%p1561_p0), %s1259_s30, 4294967040  ;;  %s2289_s0 = sadd.s32 4294967294, %s2286_s9  }
 0x3a4   : > { %s1276_s15 = sand.u32 1, %s2289_s0  }
 0x3a5   : > { %s1277_s20 = scalar_lea.sflag [#allocation5], %s1276_s15 }
 0x3a6   : > { %1770 = dma.done.wait (%p1561_p0), %s1277_s20, 272  }
 0x3a7   : > { %1772 = vsyncadd (%p1561_p0), %s1277_s20, 4294967024  ;;  %s35_s20 = sadd.s32 1, %s2286_s9   ;;  %s2290_s27 = sld [smem:[#allocation10_spill]] }
 0x3a8   : > { %p32_p3 = scmp.ge.s32.totalorder %s35_s20, 6   ;;  %s2291_s28 = sld [smem:[#allocation11_spill]] }
 0x3a9   : > { %s2292_s29 = sld [smem:[#allocation20_spill]] }
 0x3aa   : > { %s2293_s30 = sld [smem:[#allocation13_spill]]  ;;  %34 = sbr.rel (!%p32_p3) target bundleno = 17 (0x11), region = 169 }
 0x3ab   : > { %s2294_s0 = sld [smem:[#allocation14_spill]] }
 0x3ac   : > { %s2295_s19 = sld [smem:[#allocation16_spill]] }
 0x3ad   : > { %s2296_s1 = sld [smem:[#allocation18_spill]] }
 0x3af   :  { %1292 = vsyncpa [#allocation3], 1 }
 0x3b0   :  { %1294 = vsyncpa [#allocation3 + $0x1], 1 }
 0x3b1   :  { %1295 = vsyncpa [#allocation5], 1 }
 0x3b2   :  { %1297 = vsyncpa [#allocation5 + $0x1], 1 }

</bundles_post_ra>
